<compile_context>
chip_gen: v5e
topology: v5e:2x2
jax: 0.10.0
libtpu: 0.0.40
codegen_flags: <defaults>
</compile_context>

<pallas_src>
import functools

import jax
import jax.numpy as jnp
from jax.experimental import pallas as pl
from jax.experimental.pallas import tpu as pltpu


EMBED_DIM = 384
ENCODER_DIM = 16
LAYER_DIMS = [
    (EMBED_DIM, 256),   # encoder.0
    (256, 64),          # encoder.2
    (64, ENCODER_DIM),  # encoder.4
    (ENCODER_DIM, 64),  # decoder.0
    (64, 256),          # decoder.2
    (256, EMBED_DIM),   # decoder.4
]


def _autoencoder_kernel(x_ref,
                        w1, b1, w2, b2, w3, b3,
                        w4, b4, w5, b5, w6, b6,
                        o_ref):
    """Fused 6-layer MLP. bf16 MXU operands, f32 accumulation/activations."""

    def layer(h_bf16, w_ref, b_ref):
        # bf16 x bf16 matmul on the MXU, f32 accumulate, f32 bias broadcast-add.
        y = jnp.dot(h_bf16, w_ref[...], preferred_element_type=jnp.float32)
        return y + b_ref[...]

    h = x_ref[...]  # bf16 activations
    # Five Linear+ReLU layers (encoder.0/2/4, decoder.0/2).
    for w_ref, b_ref in ((w1, b1), (w2, b2), (w3, b3), (w4, b4), (w5, b5)):
        h = jnp.maximum(layer(h, w_ref, b_ref), 0.0).astype(jnp.bfloat16)
    # Final Linear + Tanh (decoder.4); tanh runs on the EUP in f32.
    o_ref[...] = jnp.tanh(layer(h, w6, b6)).astype(o_ref.dtype)


def _round_up(n, m):
    return ((n + m - 1) // m) * m


@functools.partial(jax.jit, static_argnames=("block_m",))
def autoencoder_forward(x, params, block_m=1024):
    """x: (batch, EMBED_DIM) float32. params: list of (W:(in,out), b:(1,out))."""
    batch, embed_dim = x.shape
    assert embed_dim == EMBED_DIM

    # Effective batch tile: at least the 8-sublane minimum, never larger than
    # the (8-aligned) batch so tiny batches don't allocate oversized tiles.
    bm = max(8, min(block_m, _round_up(batch, 8)))
    num_blocks = pl.cdiv(batch, bm)
    padded_batch = num_blocks * bm

    # bf16 activations into HBM/VMEM (halves input traffic, MXU-native).
    x_in = x.astype(jnp.bfloat16)
    if padded_batch != batch:
        x_in = jnp.pad(x_in, ((0, padded_batch - batch), (0, 0)))

    flat_params = []
    for w, b in params:
        flat_params.append(w.astype(jnp.bfloat16))   # MXU operand
        flat_params.append(b.astype(jnp.float32))    # f32 bias add

    # Weights/biases: full-extent blocks, constant index_map across the grid
    # -> single-buffered (no redundant double-buffer VMEM / re-DMA).
    def const_spec(shape):
        return pl.BlockSpec(shape, lambda i: tuple(0 for _ in shape),
                            pipeline_mode=pl.Buffered(1))

    in_specs = [pl.BlockSpec((bm, EMBED_DIM), lambda i: (i, 0))]
    for w, b in params:
        in_specs.append(const_spec(w.shape))
        in_specs.append(const_spec(b.shape))

    # Output stays f32 and lane-dense (384 = 3*128) -> unmasked vst stores.
    out_spec = pl.BlockSpec((bm, EMBED_DIM), lambda i: (i, 0))

    out = pl.pallas_call(
        _autoencoder_kernel,
        out_shape=jax.ShapeDtypeStruct((padded_batch, EMBED_DIM), jnp.float32),
        grid_spec=pltpu.PrefetchScalarGridSpec(
            num_scalar_prefetch=0,
            grid=(num_blocks,),
            in_specs=in_specs,
            out_specs=out_spec,
        ),
        compiler_params=pltpu.CompilerParams(
            # batch axis is independent -> shard across TensorCores (v7x megacore).
            dimension_semantics=("parallel",)),
    )(x_in, *flat_params)

    return out[:batch] if padded_batch != batch else out


def init_params(key):
    """Deterministic init matching PyTorch nn.Linear default (uniform +-1/sqrt(in))."""
    params = []
    for (fan_in, fan_out) in LAYER_DIMS:
        key, kw, kb = jax.random.split(key, 3)
        bound = 1.0 / jnp.sqrt(fan_in)
        w = jax.random.uniform(kw, (fan_in, fan_out), jnp.float32, -bound, bound)
        b = jax.random.uniform(kb, (1, fan_out), jnp.float32, -bound, bound)
        params.append((w, b))
    return params


def autoencoder_reference(x, params):
    """Pure-JAX f32 reference for correctness checking."""
    h = x
    for li, (w, b) in enumerate(params):
        h = h @ w + b
        h = jnp.maximum(h, 0.0) if li < len(params) - 1 else jnp.tanh(h)
    return h


if __name__ == "__main__":
    key = jax.random.PRNGKey(0)
    key, kx = jax.random.split(key)

    # Small example; batch intentionally not a multiple of 8 to exercise the
    # padding / pl.cdiv tail-handling path.
    batch = 12
    x = jax.random.normal(kx, (batch, EMBED_DIM), jnp.float32)
    params = init_params(key)

    out = autoencoder_forward(x, params)
    out = jax.block_until_ready(out)

    ref = autoencoder_reference(x, params)
    assert out.shape == (batch, EMBED_DIM)
    # bf16 MXU operands vs f32 reference -> loosened tolerance.
    assert jnp.allclose(out, ref, atol=5e-2, rtol=5e-2), "mismatch vs reference"

    print("KERNEL_OK")
</pallas_src>

<mosaic_0001>
module attributes {stable_mosaic.version = 11 : i64} {
  func.func @_autoencoder_kernel(%arg0: i32, %arg1: memref<16x384xbf16, #tpu.memory_space<vmem>>, %arg2: memref<384x256xbf16, #tpu.memory_space<vmem>>, %arg3: memref<1x256xf32, #tpu.memory_space<vmem>>, %arg4: memref<256x64xbf16, #tpu.memory_space<vmem>>, %arg5: memref<1x64xf32, #tpu.memory_space<vmem>>, %arg6: memref<64x16xbf16, #tpu.memory_space<vmem>>, %arg7: memref<1x16xf32, #tpu.memory_space<vmem>>, %arg8: memref<16x64xbf16, #tpu.memory_space<vmem>>, %arg9: memref<1x64xf32, #tpu.memory_space<vmem>>, %arg10: memref<64x256xbf16, #tpu.memory_space<vmem>>, %arg11: memref<1x256xf32, #tpu.memory_space<vmem>>, %arg12: memref<256x384xbf16, #tpu.memory_space<vmem>>, %arg13: memref<1x384xf32, #tpu.memory_space<vmem>>, %arg14: memref<16x384xf32, #tpu.memory_space<vmem>>) attributes {dimension_semantics = [#tpu.dimension_semantics<parallel>], iteration_bounds = array<i64: 1>, scalar_prefetch = 0 : i64, scratch_operands = 0 : i64, tpu.core_type = #tpu.core_type<tc>, window_params = [{transform_indices = @transform_0, window_bounds = array<i64: 16, 384>}, {pipeline_mode = #tpu.pipeline_mode<synchronous>, transform_indices = @transform_1, window_bounds = array<i64: 384, 256>}, {pipeline_mode = #tpu.pipeline_mode<synchronous>, transform_indices = @transform_2, window_bounds = array<i64: 1, 256>}, {pipeline_mode = #tpu.pipeline_mode<synchronous>, transform_indices = @transform_3, window_bounds = array<i64: 256, 64>}, {pipeline_mode = #tpu.pipeline_mode<synchronous>, transform_indices = @transform_4, window_bounds = array<i64: 1, 64>}, {pipeline_mode = #tpu.pipeline_mode<synchronous>, transform_indices = @transform_5, window_bounds = array<i64: 64, 16>}, {pipeline_mode = #tpu.pipeline_mode<synchronous>, transform_indices = @transform_6, window_bounds = array<i64: 1, 16>}, {pipeline_mode = #tpu.pipeline_mode<synchronous>, transform_indices = @transform_7, window_bounds = array<i64: 16, 64>}, {pipeline_mode = #tpu.pipeline_mode<synchronous>, transform_indices = @transform_8, window_bounds = array<i64: 1, 64>}, {pipeline_mode = #tpu.pipeline_mode<synchronous>, transform_indices = @transform_9, window_bounds = array<i64: 64, 256>}, {pipeline_mode = #tpu.pipeline_mode<synchronous>, transform_indices = @transform_10, window_bounds = array<i64: 1, 256>}, {pipeline_mode = #tpu.pipeline_mode<synchronous>, transform_indices = @transform_11, window_bounds = array<i64: 256, 384>}, {pipeline_mode = #tpu.pipeline_mode<synchronous>, transform_indices = @transform_12, window_bounds = array<i64: 1, 384>}, {transform_indices = @transform_13, window_bounds = array<i64: 16, 384>}]} {
    %c0 = arith.constant 0 : index
    %c0_0 = arith.constant 0 : index
    %0 = vector.load %arg1[%c0, %c0_0] : memref<16x384xbf16, #tpu.memory_space<vmem>>, vector<16x384xbf16>
    %c0_1 = arith.constant 0 : index
    %c0_2 = arith.constant 0 : index
    %1 = vector.load %arg2[%c0_1, %c0_2] : memref<384x256xbf16, #tpu.memory_space<vmem>>, vector<384x256xbf16>
    %cst = arith.constant dense<0.000000e+00> : vector<16x256xf32>
    %2 = tpu.matmul %0, %1, %cst {dimension_numbers = #tpu.dot_dimension_numbers<[1], [0], [0], [1], [0, 0, 1, 1], [], []>} : vector<16x384xbf16>, vector<384x256xbf16>, vector<16x256xf32> -> vector<16x256xf32>
    %c0_3 = arith.constant 0 : index
    %c0_4 = arith.constant 0 : index
    %3 = vector.load %arg3[%c0_3, %c0_4] : memref<1x256xf32, #tpu.memory_space<vmem>>, vector<1x256xf32>
    %4 = vector.broadcast %3 : vector<1x256xf32> to vector<16x256xf32>
    %5 = arith.addf %2, %4 : vector<16x256xf32>
    %cst_5 = arith.constant 0.000000e+00 : f32
    %6 = vector.broadcast %cst_5 : f32 to vector<16x256xf32>
    %7 = arith.maximumf %5, %6 : vector<16x256xf32>
    %8 = arith.truncf %7 : vector<16x256xf32> to vector<16x256xbf16>
    %c0_6 = arith.constant 0 : index
    %c0_7 = arith.constant 0 : index
    %9 = vector.load %arg4[%c0_6, %c0_7] : memref<256x64xbf16, #tpu.memory_space<vmem>>, vector<256x64xbf16>
    %cst_8 = arith.constant dense<0.000000e+00> : vector<16x64xf32>
    %10 = tpu.matmul %8, %9, %cst_8 {dimension_numbers = #tpu.dot_dimension_numbers<[1], [0], [0], [1], [0, 0, 1, 1], [], []>} : vector<16x256xbf16>, vector<256x64xbf16>, vector<16x64xf32> -> vector<16x64xf32>
    %c0_9 = arith.constant 0 : index
    %c0_10 = arith.constant 0 : index
    %11 = vector.load %arg5[%c0_9, %c0_10] : memref<1x64xf32, #tpu.memory_space<vmem>>, vector<1x64xf32>
    %12 = vector.broadcast %11 : vector<1x64xf32> to vector<16x64xf32>
    %13 = arith.addf %10, %12 : vector<16x64xf32>
    %cst_11 = arith.constant 0.000000e+00 : f32
    %14 = vector.broadcast %cst_11 : f32 to vector<16x64xf32>
    %15 = arith.maximumf %13, %14 : vector<16x64xf32>
    %16 = arith.truncf %15 : vector<16x64xf32> to vector<16x64xbf16>
    %c0_12 = arith.constant 0 : index
    %c0_13 = arith.constant 0 : index
    %17 = vector.load %arg6[%c0_12, %c0_13] : memref<64x16xbf16, #tpu.memory_space<vmem>>, vector<64x16xbf16>
    %cst_14 = arith.constant dense<0.000000e+00> : vector<16x16xf32>
    %18 = tpu.matmul %16, %17, %cst_14 {dimension_numbers = #tpu.dot_dimension_numbers<[1], [0], [0], [1], [0, 0, 1, 1], [], []>} : vector<16x64xbf16>, vector<64x16xbf16>, vector<16x16xf32> -> vector<16x16xf32>
    %c0_15 = arith.constant 0 : index
    %c0_16 = arith.constant 0 : index
    %19 = vector.load %arg7[%c0_15, %c0_16] : memref<1x16xf32, #tpu.memory_space<vmem>>, vector<1x16xf32>
    %20 = vector.broadcast %19 : vector<1x16xf32> to vector<16x16xf32>
    %21 = arith.addf %18, %20 : vector<16x16xf32>
    %cst_17 = arith.constant 0.000000e+00 : f32
    %22 = vector.broadcast %cst_17 : f32 to vector<16x16xf32>
    %23 = arith.maximumf %21, %22 : vector<16x16xf32>
    %24 = arith.truncf %23 : vector<16x16xf32> to vector<16x16xbf16>
    %c0_18 = arith.constant 0 : index
    %c0_19 = arith.constant 0 : index
    %25 = vector.load %arg8[%c0_18, %c0_19] : memref<16x64xbf16, #tpu.memory_space<vmem>>, vector<16x64xbf16>
    %cst_20 = arith.constant dense<0.000000e+00> : vector<16x64xf32>
    %26 = tpu.matmul %24, %25, %cst_20 {dimension_numbers = #tpu.dot_dimension_numbers<[1], [0], [0], [1], [0, 0, 1, 1], [], []>} : vector<16x16xbf16>, vector<16x64xbf16>, vector<16x64xf32> -> vector<16x64xf32>
    %c0_21 = arith.constant 0 : index
    %c0_22 = arith.constant 0 : index
    %27 = vector.load %arg9[%c0_21, %c0_22] : memref<1x64xf32, #tpu.memory_space<vmem>>, vector<1x64xf32>
    %28 = vector.broadcast %27 : vector<1x64xf32> to vector<16x64xf32>
    %29 = arith.addf %26, %28 : vector<16x64xf32>
    %cst_23 = arith.constant 0.000000e+00 : f32
    %30 = vector.broadcast %cst_23 : f32 to vector<16x64xf32>
    %31 = arith.maximumf %29, %30 : vector<16x64xf32>
    %32 = arith.truncf %31 : vector<16x64xf32> to vector<16x64xbf16>
    %c0_24 = arith.constant 0 : index
    %c0_25 = arith.constant 0 : index
    %33 = vector.load %arg10[%c0_24, %c0_25] : memref<64x256xbf16, #tpu.memory_space<vmem>>, vector<64x256xbf16>
    %cst_26 = arith.constant dense<0.000000e+00> : vector<16x256xf32>
    %34 = tpu.matmul %32, %33, %cst_26 {dimension_numbers = #tpu.dot_dimension_numbers<[1], [0], [0], [1], [0, 0, 1, 1], [], []>} : vector<16x64xbf16>, vector<64x256xbf16>, vector<16x256xf32> -> vector<16x256xf32>
    %c0_27 = arith.constant 0 : index
    %c0_28 = arith.constant 0 : index
    %35 = vector.load %arg11[%c0_27, %c0_28] : memref<1x256xf32, #tpu.memory_space<vmem>>, vector<1x256xf32>
    %36 = vector.broadcast %35 : vector<1x256xf32> to vector<16x256xf32>
    %37 = arith.addf %34, %36 : vector<16x256xf32>
    %cst_29 = arith.constant 0.000000e+00 : f32
    %38 = vector.broadcast %cst_29 : f32 to vector<16x256xf32>
    %39 = arith.maximumf %37, %38 : vector<16x256xf32>
    %40 = arith.truncf %39 : vector<16x256xf32> to vector<16x256xbf16>
    %c0_30 = arith.constant 0 : index
    %c0_31 = arith.constant 0 : index
    %41 = vector.load %arg12[%c0_30, %c0_31] : memref<256x384xbf16, #tpu.memory_space<vmem>>, vector<256x384xbf16>
    %cst_32 = arith.constant dense<0.000000e+00> : vector<16x384xf32>
    %42 = tpu.matmul %40, %41, %cst_32 {dimension_numbers = #tpu.dot_dimension_numbers<[1], [0], [0], [1], [0, 0, 1, 1], [], []>} : vector<16x256xbf16>, vector<256x384xbf16>, vector<16x384xf32> -> vector<16x384xf32>
    %c0_33 = arith.constant 0 : index
    %c0_34 = arith.constant 0 : index
    %43 = vector.load %arg13[%c0_33, %c0_34] : memref<1x384xf32, #tpu.memory_space<vmem>>, vector<1x384xf32>
    %44 = vector.broadcast %43 : vector<1x384xf32> to vector<16x384xf32>
    %45 = arith.addf %42, %44 : vector<16x384xf32>
    %46 = math.tanh %45 : vector<16x384xf32>
    %c0_35 = arith.constant 0 : index
    %c0_36 = arith.constant 0 : index
    %47 = vector.load %arg14[%c0_35, %c0_36] : memref<16x384xf32, #tpu.memory_space<vmem>>, vector<16x384xf32>
    tpu.vector_store %arg14[%c0_35, %c0_36], %46 {strides = array<i32>} : memref<16x384xf32, #tpu.memory_space<vmem>>, vector<16x384xf32>,
    return
  }
  func.func @transform_0(%arg0: i32) -> (i32, i32) {
    %c0_i32 = arith.constant 0 : i32
    %c0_i32_0 = arith.constant 0 : i32
    return %arg0, %c0_i32 : i32, i32
  }
  func.func @transform_1(%arg0: i32) -> (i32, i32) {
    %c0_i32 = arith.constant 0 : i32
    %c0_i32_0 = arith.constant 0 : i32
    %c0_i32_1 = arith.constant 0 : i32
    return %c0_i32, %c0_i32_0 : i32, i32
  }
  func.func @transform_2(%arg0: i32) -> (i32, i32) {
    %c0_i32 = arith.constant 0 : i32
    %c0_i32_0 = arith.constant 0 : i32
    %c0_i32_1 = arith.constant 0 : i32
    return %c0_i32, %c0_i32_0 : i32, i32
  }
  func.func @transform_3(%arg0: i32) -> (i32, i32) {
    %c0_i32 = arith.constant 0 : i32
    %c0_i32_0 = arith.constant 0 : i32
    %c0_i32_1 = arith.constant 0 : i32
    return %c0_i32, %c0_i32_0 : i32, i32
  }
  func.func @transform_4(%arg0: i32) -> (i32, i32) {
    %c0_i32 = arith.constant 0 : i32
    %c0_i32_0 = arith.constant 0 : i32
    %c0_i32_1 = arith.constant 0 : i32
    return %c0_i32, %c0_i32_0 : i32, i32
  }
  func.func @transform_5(%arg0: i32) -> (i32, i32) {
    %c0_i32 = arith.constant 0 : i32
    %c0_i32_0 = arith.constant 0 : i32
    %c0_i32_1 = arith.constant 0 : i32
    return %c0_i32, %c0_i32_0 : i32, i32
  }
  func.func @transform_6(%arg0: i32) -> (i32, i32) {
    %c0_i32 = arith.constant 0 : i32
    %c0_i32_0 = arith.constant 0 : i32
    %c0_i32_1 = arith.constant 0 : i32
    return %c0_i32, %c0_i32_0 : i32, i32
  }
  func.func @transform_7(%arg0: i32) -> (i32, i32) {
    %c0_i32 = arith.constant 0 : i32
    %c0_i32_0 = arith.constant 0 : i32
    %c0_i32_1 = arith.constant 0 : i32
    return %c0_i32, %c0_i32_0 : i32, i32
  }
  func.func @transform_8(%arg0: i32) -> (i32, i32) {
    %c0_i32 = arith.constant 0 : i32
    %c0_i32_0 = arith.constant 0 : i32
    %c0_i32_1 = arith.constant 0 : i32
    return %c0_i32, %c0_i32_0 : i32, i32
  }
  func.func @transform_9(%arg0: i32) -> (i32, i32) {
    %c0_i32 = arith.constant 0 : i32
    %c0_i32_0 = arith.constant 0 : i32
    %c0_i32_1 = arith.constant 0 : i32
    return %c0_i32, %c0_i32_0 : i32, i32
  }
  func.func @transform_10(%arg0: i32) -> (i32, i32) {
    %c0_i32 = arith.constant 0 : i32
    %c0_i32_0 = arith.constant 0 : i32
    %c0_i32_1 = arith.constant 0 : i32
    return %c0_i32, %c0_i32_0 : i32, i32
  }
  func.func @transform_11(%arg0: i32) -> (i32, i32) {
    %c0_i32 = arith.constant 0 : i32
    %c0_i32_0 = arith.constant 0 : i32
    %c0_i32_1 = arith.constant 0 : i32
    return %c0_i32, %c0_i32_0 : i32, i32
  }
  func.func @transform_12(%arg0: i32) -> (i32, i32) {
    %c0_i32 = arith.constant 0 : i32
    %c0_i32_0 = arith.constant 0 : i32
    %c0_i32_1 = arith.constant 0 : i32
    return %c0_i32, %c0_i32_0 : i32, i32
  }
  func.func @transform_13(%arg0: i32) -> (i32, i32) {
    %c0_i32 = arith.constant 0 : i32
    %c0_i32_0 = arith.constant 0 : i32
    return %arg0, %c0_i32 : i32, i32
  }
}

</mosaic_0001>

<bundles_post_ra>
// kernel: autoencoder_forward.1
= control target key start
LH: loop header
LB: loop body
LE: loop exit
PB: predicated region body
PF: predicated region fallthrough
CT: control target
= control target key end

     0   :  { %s2734_s0 = inlined_call_operand.vmem [shape: bf16[16,384], index: 0, kind: input, shape index: {}]   ;;  %s2735_s1 = inlined_call_operand.vmem [shape: bf16[384,256], index: 1, kind: input, shape index: {}]   ;;  %s2736_s2 = inlined_call_operand.vmem [shape: f32[1,256], index: 2, kind: input, shape index: {}]   ;;  %s2737_s3 = inlined_call_operand.vmem [shape: bf16[256,64], index: 3, kind: input, shape index: {}]   ;;  %s2738_s4 = inlined_call_operand.vmem [shape: f32[1,64], index: 4, kind: input, shape index: {}]   ;;  %s2739_s5 = inlined_call_operand.vmem [shape: bf16[64,16], index: 5, kind: input, shape index: {}]   ;;  %s2740_s6 = inlined_call_operand.vmem [shape: f32[1,16], index: 6, kind: input, shape index: {}]   ;;  %s2741_s7 = inlined_call_operand.vmem [shape: bf16[16,64], index: 7, kind: input, shape index: {}]   ;;  %s2742_s8 = inlined_call_operand.vmem [shape: f32[1,64], index: 8, kind: input, shape index: {}]   ;;  %s2743_s9 = inlined_call_operand.vmem [shape: bf16[64,256], index: 9, kind: input, shape index: {}]   ;;  %s2744_s10 = inlined_call_operand.vmem [shape: f32[1,256], index: 10, kind: input, shape index: {}]   ;;  %s2745_s11 = inlined_call_operand.vmem [shape: bf16[256,384], index: 11, kind: input, shape index: {}]   ;;  %s2746_s12 = inlined_call_operand.vmem [shape: f32[1,384], index: 12, kind: input, shape index: {}]   ;;  %s2747_s13 = inlined_call_operand.hbm [shape: f32[16,384], index: 13, kind: output, shape index: {}]  }
   0x1   :  { %v1306_v0 = vld [vmem:[%s2735_s1 + $0x70] sm:$0xf]  ;;  %v1770_v1 = vld [vmem:[%s2735_s1 + $0x74] sm:$0xf0]  ;;  %v1298_v9 = vld [vmem:[%s2735_s1 + $0x60] sm:$0xf] }
   0x2   :  { %v1370_v2 = vld [vmem:[%s2735_s1 + $0xf0] sm:$0xf]  ;;  %v1307_v3 = vor.u32 %v1770_v1, %v1306_v0  ;;  %v1786_v4 = vld [vmem:[%s2735_s1 + $0xf4] sm:$0xf0]  ;;  %v1768_v10 = vld [vmem:[%s2735_s1 + $0x64] sm:$0xf0] }
   0x3   :  { %v1434_v5 = vld [vmem:[%s2735_s1 + $0x170] sm:$0xf]  ;;  %v1802_v6 = vld [vmem:[%s2735_s1 + $0x174] sm:$0xf0]  ;;  %v1371_v7 = vor.u32 %v1786_v4, %v1370_v2  ;;  %v1362_v11 = vld [vmem:[%s2735_s1 + $0xe0] sm:$0xf]  ;;  %v1299_v12 = vor.u32 %v1768_v10, %v1298_v9 }
   0x4   :  { %v1435_v8 = vor.u32 %v1802_v6, %v1434_v5  ;;  %360 = vmatpush.bf16.msra.mxu0 %v1307_v3  ;;  %v1784_v13 = vld [vmem:[%s2735_s1 + $0xe4] sm:$0xf0]  ;;  %v1426_v14 = vld [vmem:[%s2735_s1 + $0x160] sm:$0xf]  ;;  %v1290_v18 = vld [vmem:[%s2735_s1 + $0x50] sm:$0xf] }
   0x5   :  { %v1800_v15 = vld [vmem:[%s2735_s1 + $0x164] sm:$0xf0]  ;;  %374 = vmatpush.bf16.msra.mxu1 %v1371_v7  ;;  %v1363_v16 = vor.u32 %v1784_v13, %v1362_v11  ;;  %v1766_v19 = vld [vmem:[%s2735_s1 + $0x54] sm:$0xf0]  ;;  %v1354_v20 = vld [vmem:[%s2735_s1 + $0xd0] sm:$0xf] }
   0x6   :  { %388 = vmatpush.bf16.msra.mxu2 %v1435_v8  ;;  %v1427_v17 = vor.u32 %v1800_v15, %v1426_v14  ;;  %v1782_v21 = vld [vmem:[%s2735_s1 + $0xd4] sm:$0xf0]  ;;  %v1418_v22 = vld [vmem:[%s2735_s1 + $0x150] sm:$0xf]  ;;  %v1291_v24 = vor.u32 %v1766_v19, %v1290_v18  ;;  %v1282_v25 = vld [vmem:[%s2735_s1 + $0x40] sm:$0xf] }
   0x7   :  { %v1798_v23 = vld [vmem:[%s2735_s1 + $0x154] sm:$0xf0]  ;;  %v1764_v26 = vld [vmem:[%s2735_s1 + $0x44] sm:$0xf0]  ;;  %v1355_v27 = vor.u32 %v1782_v21, %v1354_v20  ;;  %v1346_v29 = vld [vmem:[%s2735_s1 + $0xc0] sm:$0xf] }
   0x8   :  { %361 = vmatpush.bf16.msra.mxu0 %v1299_v12  ;;  %v1419_v28 = vor.u32 %v1798_v23, %v1418_v22  ;;  %v1769_v30 = vld [vmem:[%s2735_s1 + $0x74] sm:$0xf]  ;;  %v1308_v31 = vld [vmem:[%s2735_s1 + $0x78] sm:$0xf0]  ;;  %v1780_v32 = vld [vmem:[%s2735_s1 + $0xc4] sm:$0xf0]  ;;  %v1283_v37 = vor.u32 %v1764_v26, %v1282_v25 }
   0x9   :  { %375 = vmatpush.bf16.msra.mxu1 %v1363_v16  ;;  %v1410_v33 = vld [vmem:[%s2735_s1 + $0x140] sm:$0xf]  ;;  %v1796_v34 = vld [vmem:[%s2735_s1 + $0x144] sm:$0xf0]  ;;  %v1311_v35 = vor.u32 %v1769_v30, %v1308_v31  ;;  %v1767_v36 = vld [vmem:[%s2735_s1 + $0x64] sm:$0xf]  ;;  %v1347_v41 = vor.u32 %v1780_v32, %v1346_v29 }
   0xa   :  { %389 = vmatpush.bf16.msra.mxu2 %v1427_v17  ;;  %v1274_v38 = vld [vmem:[%s2735_s1 + $0x30] sm:$0xf]  ;;  %v1762_v39 = vld [vmem:[%s2735_s1 + $0x34] sm:$0xf0]  ;;  %v1300_v40 = vld [vmem:[%s2735_s1 + $0x68] sm:$0xf0]  ;;  %v1411_v42 = vor.u32 %v1796_v34, %v1410_v33 }
   0xb   :  { %402 = vmatpush.bf16.msra.mxu3 %v1311_v35  ;;  %v1338_v43 = vld [vmem:[%s2735_s1 + $0xb0] sm:$0xf]  ;;  %v1778_v44 = vld [vmem:[%s2735_s1 + $0xb4] sm:$0xf0]  ;;  %v1303_v46 = vor.u32 %v1767_v36, %v1300_v40  ;;  %v1765_v48 = vld [vmem:[%s2735_s1 + $0x54] sm:$0xf]  ;;  %v1275_v50 = vor.u32 %v1762_v39, %v1274_v38 }
   0xc   :  { %362 = vmatpush.bf16.msra.mxu0 %v1291_v24  ;;  %v1402_v45 = vld [vmem:[%s2735_s1 + $0x130] sm:$0xf]  ;;  %v1794_v47 = vld [vmem:[%s2735_s1 + $0x134] sm:$0xf0]  ;;  %v1292_v49 = vld [vmem:[%s2735_s1 + $0x58] sm:$0xf0]  ;;  %v1339_v54 = vor.u32 %v1778_v44, %v1338_v43 }
   0xd   :  { %376 = vmatpush.bf16.msra.mxu1 %v1355_v27  ;;  %v1266_v51 = vld [vmem:[%s2735_s1 + $0x20] sm:$0xf]  ;;  %v1760_v52 = vld [vmem:[%s2735_s1 + $0x24] sm:$0xf0]  ;;  %v1295_v53 = vor.u32 %v1765_v48, %v1292_v49  ;;  %v1403_v55 = vor.u32 %v1794_v47, %v1402_v45  ;;  %v1763_v57 = vld [vmem:[%s2735_s1 + $0x44] sm:$0xf] }
   0xe   :  { %390 = vmatpush.bf16.msra.mxu2 %v1419_v28  ;;  %v1330_v56 = vld [vmem:[%s2735_s1 + $0xa0] sm:$0xf]  ;;  %v1284_v58 = vld [vmem:[%s2735_s1 + $0x48] sm:$0xf0]  ;;  %v1776_v59 = vld [vmem:[%s2735_s1 + $0xa4] sm:$0xf0]  ;;  %v1267_v62 = vor.u32 %v1760_v52, %v1266_v51 }
   0xf   :  { %403 = vmatpush.bf16.msra.mxu3 %v1303_v46  ;;  %v1394_v60 = vld [vmem:[%s2735_s1 + $0x120] sm:$0xf]  ;;  %v1792_v61 = vld [vmem:[%s2735_s1 + $0x124] sm:$0xf0]  ;;  %v1258_v63 = vld [vmem:[%s2735_s1 + $0x10] sm:$0xf]  ;;  %v1287_v1 = vor.u32 %v1763_v57, %v1284_v58  ;;  %v1331_v2 = vor.u32 %v1776_v59, %v1330_v56 }
  0x10   :  { %363 = vmatpush.bf16.msra.mxu0 %v1283_v37  ;;  %v1758_v0 = vld [vmem:[%s2735_s1 + $0x14] sm:$0xf0]  ;;  %v1395_v3 = vor.u32 %v1792_v61, %v1394_v60  ;;  %v1322_v4 = vld [vmem:[%s2735_s1 + $0x90] sm:$0xf]  ;;  %v1761_v5 = vld [vmem:[%s2735_s1 + $0x34] sm:$0xf] }
  0x11   :  { %377 = vmatpush.bf16.msra.mxu1 %v1347_v41  ;;  %v1276_v6 = vld [vmem:[%s2735_s1 + $0x38] sm:$0xf0]  ;;  %v1774_v7 = vld [vmem:[%s2735_s1 + $0x94] sm:$0xf0]  ;;  %v1386_v8 = vld [vmem:[%s2735_s1 + $0x110] sm:$0xf]  ;;  %v1259_v10 = vor.u32 %v1758_v0, %v1258_v63 }
  0x12   :  { %391 = vmatpush.bf16.msra.mxu2 %v1411_v42  ;;  %v1790_v9 = vld [vmem:[%s2735_s1 + $0x114] sm:$0xf0]  ;;  %v1250_v11 = vld [vmem:[%s2735_s1] sm:$0xf]  ;;  %v1756_v12 = vld [vmem:[%s2735_s1 + $0x4] sm:$0xf0]  ;;  %v1279_v14 = vor.u32 %v1761_v5, %v1276_v6  ;;  %v1323_v15 = vor.u32 %v1774_v7, %v1322_v4 }
  0x13   :  { %404 = vmatpush.bf16.msra.mxu3 %v1295_v53  ;;  %v1314_v13 = vld [vmem:[%s2735_s1 + $0x80] sm:$0xf]  ;;  %v1387_v16 = vor.u32 %v1790_v9, %v1386_v8  ;;  %v1772_v17 = vld [vmem:[%s2735_s1 + $0x84] sm:$0xf0]  ;;  %v1759_v18 = vld [vmem:[%s2735_s1 + $0x24] sm:$0xf]  ;;  %v1251_v26 = vor.u32 %v1756_v12, %v1250_v11 }
  0x14   :  { %364 = vmatpush.bf16.msra.mxu0 %v1275_v50  ;;  %v1268_v19 = vld [vmem:[%s2735_s1 + $0x28] sm:$0xf0]  ;;  %v1378_v20 = vld [vmem:[%s2735_s1 + $0x100] sm:$0xf]  ;;  %v1788_v21 = vld [vmem:[%s2735_s1 + $0x104] sm:$0xf0]  ;;  %v1315_v31 = vor.u32 %v1772_v17, %v1314_v13 }
  0x15   :  { %378 = vmatpush.bf16.msra.mxu1 %v1339_v54  ;;  %v1785_v22 = vld [vmem:[%s2735_s1 + $0xf4] sm:$0xf]  ;;  %v1372_v23 = vld [vmem:[%s2735_s1 + $0xf8] sm:$0xf0]  ;;  %v1246_v27 = vld [vmem:[%s2734_s0 + $0x8] sm:$0xf]  ;;  %v1271_v30 = vor.u32 %v1759_v18, %v1268_v19  ;;  %v1379_v32 = vor.u32 %v1788_v21, %v1378_v20 }
  0x16   :  { %392 = vmatpush.bf16.msra.mxu2 %v1403_v55  ;;  %v1801_v24 = vld [vmem:[%s2735_s1 + $0x174] sm:$0xf]  ;;  %v1436_v25 = vld [vmem:[%s2735_s1 + $0x178] sm:$0xf0]  ;;  %v1238_v28 = vld [vmem:[%s2734_s0] sm:$0xf]  ;;  %v1375_v36 = vor.u32 %v1785_v22, %v1372_v23 }
  0x17   :  { %405 = vmatpush.bf16.msra.mxu3 %v1287_v1  ;;  %v1753_v29 = vld [vmem:[%s2734_s0 + $0x8] sm:$0xf0]  ;;  %v1754_v33 = vld [vmem:[%s2734_s0 + $0x10] sm:$0xf0]  ;;  %v1752_v34 = vld [vmem:[%s2734_s0 + $0x4] sm:$0xf]  ;;  %v1439_v37 = vor.u32 %v1801_v24, %v1436_v25 }
  0x18   :  { %365 = vmatpush.bf16.msra.mxu0 %v1267_v62  ;;  %v1240_v35 = vld [vmem:[%s2734_s0 + $0xc] sm:$0xf0]  ;;  %v1783_v38 = vld [vmem:[%s2735_s1 + $0xe4] sm:$0xf]  ;;  %v1757_v39 = vld [vmem:[%s2735_s1 + $0x14] sm:$0xf]  ;;  %v1239_v41 = vor.u32 %v1753_v29, %v1238_v28  ;;  %v2225_v45 = vor.u32 %v1754_v33, %v1246_v27 }
  0x19   :  { %379 = vmatpush.bf16.msra.mxu1 %v1331_v2  ;;  %v1260_v40 = vld [vmem:[%s2735_s1 + $0x18] sm:$0xf0]  ;;  %v1364_v42 = vld [vmem:[%s2735_s1 + $0xe8] sm:$0xf0]  ;;  %v1799_v43 = vld [vmem:[%s2735_s1 + $0x164] sm:$0xf]  ;;  %v2227_v46 = vor.u32 %v1752_v34, %v1240_v35 }
  0x1a   :  { %393 = vmatpush.bf16.msra.mxu2 %v1395_v3  ;;  %v1428_v44 = vld [vmem:[%s2735_s1 + $0x168] sm:$0xf0]  ;;  %v1263_v47 = vor.u32 %v1757_v39, %v1260_v40  ;;  %v1781_v48 = vld [vmem:[%s2735_s1 + $0xd4] sm:$0xf]  ;;  %v1367_v49 = vor.u32 %v1783_v38, %v1364_v42  ;;  %v1356_v51 = vld [vmem:[%s2735_s1 + $0xd8] sm:$0xf0] }
  0x1b   :  { %406 = vmatpush.bf16.msra.mxu3 %v1279_v14  ;;  %v1431_v50 = vor.u32 %v1799_v43, %v1428_v44  ;;  %v1755_v52 = vld [vmem:[%s2735_s1 + $0x4] sm:$0xf]  ;;  %v1252_v53 = vld [vmem:[%s2735_s1 + $0x8] sm:$0xf0]  ;;  %v1797_v54 = vld [vmem:[%s2735_s1 + $0x154] sm:$0xf] }
  0x1c   :  { %366 = vmatpush.bf16.msra.mxu0 %v1259_v10  ;;  %v1420_v55 = vld [vmem:[%s2735_s1 + $0x158] sm:$0xf0]  ;;  %v1255_v57 = vor.u32 %v1755_v52, %v1252_v53  ;;  %v1809_v58 = vld [vmem:[%s2737_s3 + $0x30] sm:$0xff] }
  0x1d   :  { %380 = vmatpush.bf16.msra.mxu1 %v1323_v15  ;;  %v1810_v56 = vld [vmem:[%s2737_s3 + $0x38] sm:$0xff] }
  0x1e   :  { %394 = vmatpush.bf16.msra.mxu2 %v1387_v16 }
  0x1f   :  { %407 = vmatpush.bf16.msra.mxu3 %v1271_v30 }
  0x20   :  { %367 = vmatpush.bf16.msra.mxu0 %v1251_v26 }
  0x21   :  { %381 = vmatpush.bf16.msra.mxu1 %v1315_v31 }
  0x22   :  { %395 = vmatpush.bf16.msra.mxu2 %v1379_v32 }
  0x23   :  { %368 = vmatmul.bf16.vlgmr.msra.gmra.mxu0 %v1239_v41  ;;  %408 = vmatpush.bf16.msra.mxu3 %v1263_v47 }
  0x24   :  { %416 = vmatpush.bf16.msrb.mxu0 %v1375_v36  ;;  %382 = vmatmul.bf16.vlgmr.msra.gmra.mxu1 %v2227_v46 }
  0x25   :  { %430 = vmatpush.bf16.msrb.mxu1 %v1439_v37  ;;  %396 = vmatmul.bf16.vlgmr.msra.gmra.mxu2 %v2225_v45 }
  0x26   :  { %582 = vmatpush.bf16.msrb.mxu2 %v1810_v56 }
  0x27   :  { %18 = vsyncpa [#allocation3], 0  ;;  %v1359_v59 = vor.u32 %v1781_v48, %v1356_v51  ;;  %v1423_v60 = vor.u32 %v1797_v54, %v1420_v55  ;;  %v1779_v61 = vld [vmem:[%s2735_s1 + $0xc4] sm:$0xf]  ;;  %v1348_v62 = vld [vmem:[%s2735_s1 + $0xc8] sm:$0xf0]  ;;  %409 = vmatpush.bf16.msra.mxu3 %v1255_v57 }
  0x28   :  { %417 = vmatpush.bf16.msrb.mxu0 %v1367_v49  ;;  %v1795_v63 = vld [vmem:[%s2735_s1 + $0x144] sm:$0xf]  ;;  %v1412_v0 = vld [vmem:[%s2735_s1 + $0x148] sm:$0xf0]  ;;  %v1351_v2 = vor.u32 %v1779_v61, %v1348_v62  ;;  %v1777_v4 = vld [vmem:[%s2735_s1 + $0xb4] sm:$0xf] }
  0x29   :  { %431 = vmatpush.bf16.msrb.mxu1 %v1431_v50  ;;  %v1808_v1 = vld [vmem:[%s2737_s3 + $0x28] sm:$0xff]  ;;  %v1415_v3 = vor.u32 %v1795_v63, %v1412_v0  ;;  %v1340_v5 = vld [vmem:[%s2735_s1 + $0xb8] sm:$0xf0]  ;;  %v1793_v6 = vld [vmem:[%s2735_s1 + $0x134] sm:$0xf]  ;;  %vm649_vm0 = vcmask 523264  }
  0x2a   :  { %583 = vmatpush.bf16.msrb.mxu2 %v1809_v58  ;;  %v1404_v7 = vld [vmem:[%s2735_s1 + $0x138] sm:$0xf0]  ;;  %410 = vmatmul.bf16.vlgmr.msra.gmra.mxu3 %v1239_v41  ;;  %v1343_v8 = vor.u32 %v1777_v4, %v1340_v5  ;;  %v1775_v10 = vld [vmem:[%s2735_s1 + $0xa4] sm:$0xf]  ;;  %v1332_v11 = vld [vmem:[%s2735_s1 + $0xa8] sm:$0xf0] }
  0x2b   :  { %v1407_v9 = vor.u32 %v1793_v6, %v1404_v7  ;;  %v1791_v12 = vld [vmem:[%s2735_s1 + $0x124] sm:$0xf]  ;;  %v1396_v13 = vld [vmem:[%s2735_s1 + $0x128] sm:$0xf0]  ;;  %v1335_v14 = vor.u32 %v1775_v10, %v1332_v11  ;;  %v1773_v16 = vld [vmem:[%s2735_s1 + $0x94] sm:$0xf] }
  0x2c   :  { %418 = vmatpush.bf16.msrb.mxu0 %v1359_v59  ;;  %v1399_v15 = vor.u32 %v1791_v12, %v1396_v13  ;;  %v1324_v17 = vld [vmem:[%s2735_s1 + $0x98] sm:$0xf0]  ;;  %v1789_v18 = vld [vmem:[%s2735_s1 + $0x114] sm:$0xf]  ;;  %v1771_v22 = vld [vmem:[%s2735_s1 + $0x84] sm:$0xf] }
  0x2d   :  { %432 = vmatpush.bf16.msrb.mxu1 %v1423_v60  ;;  %v1388_v19 = vld [vmem:[%s2735_s1 + $0x118] sm:$0xf0]  ;;  %v1327_v20 = vor.u32 %v1773_v16, %v1324_v17  ;;  %v1316_v23 = vld [vmem:[%s2735_s1 + $0x88] sm:$0xf0]  ;;  %v1787_v24 = vld [vmem:[%s2735_s1 + $0x104] sm:$0xf] }
  0x2e   :  { %584 = vmatpush.bf16.msrb.mxu2 %v1808_v1  ;;  %v1391_v21 = vor.u32 %v1789_v18, %v1388_v19  ;;  %v1380_v25 = vld [vmem:[%s2735_s1 + $0x108] sm:$0xf0]  ;;  %v1319_v26 = vor.u32 %v1771_v22, %v1316_v23  ;;  %v1807_v28 = vld [vmem:[%s2737_s3 + $0x20] sm:$0xff]  ;;  %v1806_v29 = vld [vmem:[%s2737_s3 + $0x18] sm:$0xff]  ;;  %vm682_vm1 = vcmask 130048   ;;  %s1224_s22 = sshll.u32 %s2747_s13, 4  ;;  %s1225_s22 = int_to_ptr.hbm [resolvable:$true] %s1224_s22 }
  0x2f   :  { %v1383_v27 = vor.u32 %v1787_v24, %v1380_v25  ;;  %v1805_v30 = vld [vmem:[%s2737_s3 + $0x10] sm:$0xff]  ;;  %v1804_v31 = vld [vmem:[%s2737_s3 + $0x8] sm:$0xff]  ;;  %v1818_v32 = vld [vmem:[%s2737_s3 + $0x78] sm:$0xff]  ;;  %s1925_s23 = smov 384   ;;  %s1926_s24 = smov 24  }
  0x30   :  { %419 = vmatpush.bf16.msrb.mxu0 %v1351_v2  ;;  %596 = vmatpush.bf16.msrb.mxu3 %v1818_v32  ;;  %v1803_v33 = vld [vmem:[%s2737_s3] sm:$0xff]  ;;  %v1817_v34 = vld [vmem:[%s2737_s3 + $0x70] sm:$0xff]  ;;  %v1816_v35 = vld [vmem:[%s2737_s3 + $0x68] sm:$0xff] }
  0x31   :  { %433 = vmatpush.bf16.msrb.mxu1 %v1415_v3  ;;  %v1815_v36 = vld [vmem:[%s2737_s3 + $0x60] sm:$0xff]  ;;  %v1814_v38 = vld [vmem:[%s2737_s3 + $0x58] sm:$0xff]  ;;  %v1813_v42 = vld [vmem:[%s2737_s3 + $0x50] sm:$0xff] }
  0x32   :  { %585 = vmatpush.bf16.msrb.mxu2 %v1807_v28  ;;  %v98_v37 = vld [vmem:[%s2736_s2] sm:$0x3]  ;;  %v1812_v44 = vld [vmem:[%s2737_s3 + $0x48] sm:$0xff]  ;;  %v1822_v10 = vld [vmem:[%s2739_s5 + $0x18] sm:$0xff] }
  0x33   :  { %v100_v39 = vperm.slane %v98_v37, 0  ;;  %v1811_v50 = vld [vmem:[%s2737_s3 + $0x40] sm:$0xff]  ;;  %v101_v59 = vperm.slane %v98_v37, 1  ;;  %v1821_v11 = vld [vmem:[%s2739_s5 + $0x10] sm:$0xff]  ;;  %v1820_v12 = vld [vmem:[%s2739_s5 + $0x8] sm:$0xff] }
  0x34   :  { %420 = vmatpush.bf16.msrb.mxu0 %v1343_v8  ;;  %597 = vmatpush.bf16.msrb.mxu3 %v1817_v34  ;;  %v1819_v13 = vld [vmem:[%s2739_s5] sm:$0xff]  ;;  %v1831_v28 = vld [vmem:[%s2743_s9 + $0x34] sm:$0xf0] }
  0x35   :  { %434 = vmatpush.bf16.msrb.mxu1 %v1407_v9  ;;  %v1883_v17 = vld [vmem:[%s2738_s4] ss:$0 sm:$0xff] }
  0x36   :  { %586 = vmatpush.bf16.msrb.mxu2 %v1806_v29 }
  0x38   :  { %421 = vmatpush.bf16.msrb.mxu0 %v1335_v14  ;;  %598 = vmatpush.bf16.msrb.mxu3 %v1816_v35  ;;  %v1823_v14 = vld [vmem:[%s2741_s7] sm:$0xff] }
  0x39   :  { %435 = vmatpush.bf16.msrb.mxu1 %v1399_v15 }
  0x3a   :  { %587 = vmatpush.bf16.msrb.mxu2 %v1805_v30 }
  0x3c   :  { %422 = vmatpush.bf16.msrb.mxu0 %v1327_v20  ;;  %599 = vmatpush.bf16.msrb.mxu3 %v1815_v36 }
  0x3d   :  { %436 = vmatpush.bf16.msrb.mxu1 %v1391_v21 }
  0x3e   :  { %588 = vmatpush.bf16.msrb.mxu2 %v1804_v31  ;;  %v1884_v31 = vld [vmem:[%s2740_s6] ss:$0 sm:$0xff] }
  0x40   :  { %423 = vmatpush.bf16.msrb.mxu0 %v1319_v26  ;;  %600 = vmatpush.bf16.msrb.mxu3 %v1814_v38  ;;  %v1830_v38 = vld [vmem:[%s2743_s9 + $0x34] sm:$0xf] }
  0x41   :  { %437 = vmatpush.bf16.msrb.mxu1 %v1383_v27  ;;  %v1552_v27 = vld [vmem:[%s2743_s9 + $0x30] sm:$0xf] }
  0x42   :  { %589 = vmatpush.bf16.msrb.mxu2 %v1803_v33  ;;  %v1553_v29 = vor.u32 %v1831_v28, %v1552_v27  ;;  %v1732_v27 = vld [vmem:[%s2745_s11 + $0x15c] sm:$0xf0] }
  0x43   :  { %424 = vmatmul.bf16.vlgmr.msrb.gmra.mxu0 %v2227_v46 }
  0x44   :  { %438 = vmatmul.bf16.vlgmr.msrb.gmra.mxu1 %v2225_v45  ;;  %601 = vmatpush.bf16.msrb.mxu3 %v1813_v42  ;;  %v1829_v42 = vld [vmem:[%s2743_s9 + $0x24] sm:$0xf0] }
  0x46   :  { %657 = vmatpush.bf16.msra.mxu2 %v1822_v10  ;;  %v1872_v10 = vld [vmem:[%s2745_s11 + $0x140] sm:$0xf0] }
  0x48   :  { %602 = vmatpush.bf16.msrb.mxu3 %v1812_v44 }
  0x4a   :  { %658 = vmatpush.bf16.msra.mxu2 %v1821_v11  ;;  %v1853_v11 = vld [vmem:[%s2745_s11 + $0xac] sm:$0xf] }
  0x4c   :  { %603 = vmatpush.bf16.msrb.mxu3 %v1811_v50  ;;  %v1826_v50 = vld [vmem:[%s2743_s9 + $0x14] sm:$0xf] }
  0x4e   :  { %659 = vmatpush.bf16.msra.mxu2 %v1820_v12  ;;  %v1648_v12 = vld [vmem:[%s2745_s11 + $0xb4] sm:$0xf0] }
  0x50   :  { %693 = vmatpush.bf16.msra.mxu3 %v1823_v14  ;;  %v1877_v14 = vld [vmem:[%s2745_s11 + $0x16c] sm:$0xf] }
  0x52   :  { %660 = vmatpush.bf16.msra.mxu2 %v1819_v13  ;;  %v1651_v13 = vor.u32 %v1853_v11, %v1648_v12  ;;  %v1841_v11 = vld [vmem:[%s2745_s11 + $0x4c] sm:$0xf]  ;;  %v1600_v12 = vld [vmem:[%s2745_s11 + $0x54] sm:$0xf0] }
  0xa0   :  { %v369_v40 = vpop.f32.mrf.mxu0 }
  0xa1   :  { %v383_v41 = vpop.f32.mrf.mxu1  ;;  %v370_v43 = vadd.f32 %v369_v40, %v100_v39 }
  0xa3   :  { %v384_v46 = vadd.f32 %v383_v41, %v370_v43  ;;  %v1544_v41 = vld [vmem:[%s2743_s9 + $0x20] sm:$0xf]  ;;  %v1828_v43 = vld [vmem:[%s2743_s9 + $0x24] sm:$0xf] }
  0xa4   :  { %v1545_v44 = vor.u32 %v1829_v42, %v1544_v41  ;;  %v1844_v41 = vld [vmem:[%s2745_s11 + $0x64] sm:$0xf]  ;;  %v1612_v42 = vld [vmem:[%s2745_s11 + $0x6c] sm:$0xf0] }
  0xa8   :  { %v397_v45 = vpop.f32.mrf.mxu2  ;;  %v371_v47 = vpop.f32.mrf.mxu0 }
  0xa9   :  { %v372_v48 = vadd.f32 %v371_v47, %v100_v39  ;;  %v385_v49 = vpop.f32.mrf.mxu1  ;;  %v398_v51 = vadd.f32 %v397_v45, %v384_v46  ;;  %v1554_v39 = vld [vmem:[%s2743_s9 + $0x38] sm:$0xf0]  ;;  %v1546_v45 = vld [vmem:[%s2743_s9 + $0x28] sm:$0xf0]  ;;  %v1536_v47 = vld [vmem:[%s2743_s9 + $0x10] sm:$0xf] }
  0xaa   :  { %v1557_v40 = vor.u32 %v1830_v38, %v1554_v39  ;;  %v1549_v46 = vor.u32 %v1828_v43, %v1546_v45  ;;  %v1866_v39 = vld [vmem:[%s2745_s11 + $0x110] sm:$0xf0]  ;;  %v1868_v43 = vld [vmem:[%s2745_s11 + $0x124] sm:$0xf] }
  0xab   :  { %v386_v52 = vadd.f32 %v385_v49, %v372_v48  ;;  %v444_v54 = vmax.f32 %v398_v51, 0.0  ;;  %v1827_v48 = vld [vmem:[%s2743_s9 + $0x14] sm:$0xf0]  ;;  %v1538_v51 = vld [vmem:[%s2743_s9 + $0x18] sm:$0xf0] }
  0xac   :  { %v1537_v49 = vor.u32 %v1827_v48, %v1536_v47  ;;  %v1586_v47 = vld [vmem:[%s2745_s11 + $0x30] sm:$0xf]  ;;  %v1839_v48 = vld [vmem:[%s2745_s11 + $0x38] sm:$0xf0] }
  0xad   :  { %v411_v58 = vpop.f32.mrf.mxu3 }
  0xae   :  { %v412_v62 = vadd.f32 %v411_v58, %v101_v59 }
  0xb0   :  { %v399_v53 = vpop.f32.mrf.mxu2 }
  0xb1   :  { %v400_v55 = vadd.f32 %v399_v53, %v386_v52  ;;  %v1541_v52 = vor.u32 %v1826_v50, %v1538_v51  ;;  %v1528_v53 = vld [vmem:[%s2743_s9] sm:$0xf]  ;;  %v1682_v51 = vld [vmem:[%s2745_s11 + $0xf0] sm:$0xf] }
  0xb3   :  { %v446_v56 = vmax.f32 %v400_v55, 0.0  ;;  %v1824_v55 = vld [vmem:[%s2743_s9 + $0x4] sm:$0xf] }
  0xb5   :  { %v448_v57 = vpack.c.bf16 %v446_v56, %v444_v54  ;;  %v413_v63 = vpop.f32.mrf.mxu3  ;;  %v1825_v54 = vld [vmem:[%s2743_s9 + $0x4] sm:$0xf0] }
  0xb6   :  { %v414_v1 = vadd.f32 %v413_v63, %v101_v59  ;;  %v1529_v56 = vor.u32 %v1825_v54, %v1528_v53  ;;  %v1646_v59 = vld [vmem:[%s2745_s11 + $0xa8] sm:$0xf]  ;;  %v1878_v63 = vld [vmem:[%s2745_s11 + $0x170] sm:$0xf0]  ;;  %v1587_v54 = vor.u32 %v1839_v48, %v1586_v47  ;;  %v1832_v47 = vld [vmem:[%s2745_s11 + $0x4] sm:$0xf] }
  0xb7   :  { %590 = vmatmul.bf16.vlgmr.msrb.gmra.mxu2 %v448_v57  ;;  %v1530_v57 = vld [vmem:[%s2743_s9 + $0x8] sm:$0xf0]  ;;  %v1564_v48 = vld [vmem:[%s2745_s11 + $0xc] sm:$0xf0] }
  0xb8   :  { %764 = vmatpush.bf16.msrb.mxu2 %v1553_v29  ;;  %v1533_v58 = vor.u32 %v1824_v55, %v1530_v57  ;;  %v1847_v29 = vld [vmem:[%s2745_s11 + $0x7c] sm:$0xf]  ;;  %v1885_v55 = vld [vmem:[%s2742_s8] ss:$0 sm:$0xff]  ;;  %v1574_v57 = vld [vmem:[%s2745_s11 + $0x18] sm:$0xf] }
  0xbc   :  { %765 = vmatpush.bf16.msrb.mxu2 %v1545_v44  ;;  %v1708_v44 = vld [vmem:[%s2745_s11 + $0x12c] sm:$0xf0] }
  0xbd   :  { %v1711_v53 = vor.u32 %v1868_v43, %v1708_v44  ;;  %v1726_v44 = vld [vmem:[%s2745_s11 + $0x140] sm:$0xf] }
  0xc0   :  { %v425_v60 = vpop.f32.mrf.mxu0  ;;  %766 = vmatpush.bf16.msrb.mxu2 %v1537_v49  ;;  %v1615_v49 = vor.u32 %v1844_v41, %v1612_v42  ;;  %v1849_v41 = vld [vmem:[%s2745_s11 + $0x88] sm:$0xf0] }
  0xc1   :  { %v439_v61 = vpop.f32.mrf.mxu1  ;;  %v426_v0 = vadd.f32 %v425_v60, %v412_v62  ;;  %v1854_v60 = vld [vmem:[%s2745_s11 + $0xb0] sm:$0xf0] }
  0xc2   :  { %v1647_v62 = vor.u32 %v1854_v60, %v1646_v59  ;;  %v1670_v59 = vld [vmem:[%s2745_s11 + $0xd8] sm:$0xf]  ;;  %v1860_v60 = vld [vmem:[%s2745_s11 + $0xe0] sm:$0xf0] }
  0xc3   :  { %v440_v3 = vadd.f32 %v439_v61, %v426_v0  ;;  %v1742_v61 = vld [vmem:[%s2745_s11 + $0x168] sm:$0xf]  ;;  %v1634_v0 = vld [vmem:[%s2745_s11 + $0x90] sm:$0xf] }
  0xc4   :  { %767 = vmatpush.bf16.msrb.mxu2 %v1529_v56  ;;  %1122 = vmatpush.bf16.msra.mxu0 %v1647_v62 }
  0xc5   :  { %v445_v7 = vmax.f32 %v440_v3, 0.0  ;;  %v1730_v3 = vld [vmem:[%s2745_s11 + $0x150] sm:$0xf] }
  0xc8   :  { %v427_v2 = vpop.f32.mrf.mxu0 }
  0xc9   :  { %v428_v4 = vadd.f32 %v427_v2, %v414_v1  ;;  %v441_v5 = vpop.f32.mrf.mxu1  ;;  %v1851_v1 = vld [vmem:[%s2745_s11 + $0x98] sm:$0xf0]  ;;  %v1743_v2 = vor.u32 %v1878_v63, %v1742_v61  ;;  %v1671_v63 = vor.u32 %v1860_v60, %v1670_v59  ;;  %v1606_v59 = vld [vmem:[%s2745_s11 + $0x50] sm:$0xf] }
  0xca   :  { %v1843_v60 = vld [vmem:[%s2745_s11 + $0x58] sm:$0xf0] }
  0xcb   :  { %v442_v6 = vadd.f32 %v441_v5, %v428_v4  ;;  %v1875_v4 = vld [vmem:[%s2745_s11 + $0x158] sm:$0xf0]  ;;  %v1635_v5 = vor.u32 %v1851_v1, %v1634_v0  ;;  %1136 = vmatpush.bf16.msra.mxu1 %v1743_v2  ;;  %v1562_v0 = vld [vmem:[%s2745_s11] sm:$0xf]  ;;  %v1833_v1 = vld [vmem:[%s2745_s11 + $0x8] sm:$0xf0] }
  0xcd   :  { %v447_v8 = vmax.f32 %v442_v6, 0.0  ;;  %v1731_v6 = vor.u32 %v1875_v4, %v1730_v3  ;;  %1123 = vmatpush.bf16.msra.mxu0 %v1635_v5  ;;  %v1658_v4 = vld [vmem:[%s2745_s11 + $0xc0] sm:$0xf]  ;;  %v1857_v5 = vld [vmem:[%s2745_s11 + $0xc8] sm:$0xf0] }
  0xcf   :  { %v449_v9 = vpack.c.bf16 %v447_v8, %v445_v7  ;;  %v1622_v7 = vld [vmem:[%s2745_s11 + $0x78] sm:$0xf]  ;;  %v1848_v8 = vld [vmem:[%s2745_s11 + $0x80] sm:$0xf0]  ;;  %1137 = vmatpush.bf16.msra.mxu1 %v1731_v6  ;;  %v1563_v6 = vor.u32 %v1833_v1, %v1562_v0 }
  0xd0   :  { %v1594_v1 = vld [vmem:[%s2745_s11 + $0x38] sm:$0xf] }
  0xd1   :  { %604 = vmatmul.bf16.vlgmr.msrb.gmra.mxu3 %v449_v9  ;;  %v1718_v9 = vld [vmem:[%s2745_s11 + $0x138] sm:$0xf] }
  0xd2   :  { %778 = vmatpush.bf16.msrb.mxu3 %v1557_v40 }
  0xd6   :  { %779 = vmatpush.bf16.msrb.mxu3 %v1549_v46 }
  0xda   :  { %780 = vmatpush.bf16.msrb.mxu3 %v1541_v52  ;;  %v1863_v52 = vld [vmem:[%s2745_s11 + $0xf8] sm:$0xf0] }
  0xdb   :  { %v1683_v56 = vor.u32 %v1863_v52, %v1682_v51  ;;  %v1660_v51 = vld [vmem:[%s2745_s11 + $0xcc] sm:$0xf0]  ;;  %v1618_v52 = vld [vmem:[%s2745_s11 + $0x68] sm:$0xf] }
  0xde   :  { %781 = vmatpush.bf16.msrb.mxu3 %v1533_v58  ;;  %v1836_v58 = vld [vmem:[%s2745_s11 + $0x20] sm:$0xf0] }
  0xdf   :  { %v1575_v61 = vor.u32 %v1836_v58, %v1574_v57  ;;  %v1870_v57 = vld [vmem:[%s2745_s11 + $0x130] sm:$0xf0] }
 0x13a   :  { %v591_v15 = vpop.f32.mrf.mxu2 }
 0x13b   :  { %v592_v19 = vadd.f32 %v1883_v17, %v591_v15  ;;  %v1744_v15 = vld [vmem:[%s2745_s11 + $0x174] sm:$0xf0] }
 0x142   :  { %v593_v18 = vpop.f32.mrf.mxu2 }
 0x143   :  { %v594_v20 = vadd.f32 %v1883_v17, %v593_v18  ;;  %v1610_v17 = vld [vmem:[%s2745_s11 + $0x60] sm:$0xf]  ;;  %v1845_v18 = vld [vmem:[%s2745_s11 + $0x68] sm:$0xf0] }
 0x154   :  { %v605_v16 = vpop.f32.mrf.mxu3 }
 0x155   :  { %v606_v21 = vadd.f32 %v605_v16, %v592_v19  ;;  %v1623_v16 = vor.u32 %v1848_v8, %v1622_v7  ;;  %v1747_v19 = vor.u32 %v1877_v14, %v1744_v15  ;;  %v1603_v14 = vor.u32 %v1841_v11, %v1600_v12  ;;  %v1696_v15 = vld [vmem:[%s2745_s11 + $0x114] sm:$0xf0] }
 0x157   :  { %v610_v24 = vmax.f32 %v606_v21, 0.0  ;;  %v1850_v21 = vld [vmem:[%s2745_s11 + $0x94] sm:$0xf]  ;;  %1124 = vmatpush.bf16.msra.mxu0 %v1623_v16  ;;  %v1654_v16 = vld [vmem:[%s2745_s11 + $0xb0] sm:$0xf] }
 0x15c   :  { %v607_v22 = vpop.f32.mrf.mxu3 }
 0x15d   :  { %v608_v23 = vadd.f32 %v607_v22, %v594_v20  ;;  %v1719_v20 = vor.u32 %v1872_v10, %v1718_v9  ;;  %v1636_v22 = vld [vmem:[%s2745_s11 + $0x9c] sm:$0xf0]  ;;  %v1659_v9 = vor.u32 %v1857_v5, %v1658_v4  ;;  %v1864_v5 = vld [vmem:[%s2745_s11 + $0x100] sm:$0xf0] }
 0x15f   :  { %v611_v25 = vmax.f32 %v608_v23, 0.0  ;;  %v1874_v23 = vld [vmem:[%s2745_s11 + $0x154] sm:$0xf]  ;;  %1138 = vmatpush.bf16.msra.mxu1 %v1719_v20  ;;  %v1750_v20 = vld [vmem:[%s2745_s11 + $0x170] sm:$0xf] }
 0x160   :  { %v1735_v28 = vor.u32 %v1874_v23, %v1732_v27  ;;  %v1838_v23 = vld [vmem:[%s2745_s11 + $0x34] sm:$0xf]  ;;  %v1684_v27 = vld [vmem:[%s2745_s11 + $0xfc] sm:$0xf0] }
 0x161   :  { %v612_v26 = vpack.c.bf16 %v611_v25, %v610_v24  ;;  %v1706_v24 = vld [vmem:[%s2745_s11 + $0x120] sm:$0xf]  ;;  %v1869_v25 = vld [vmem:[%s2745_s11 + $0x128] sm:$0xf0] }
 0x163   :  { %1520 = vmatmul.msk.bf16.vlgmr.msra.gmra.mxu2 %vm649_vm0, %v612_v26  ;;  %v1639_v26 = vor.u32 %v1850_v21, %v1636_v22  ;;  %v1879_v21 = vld [vmem:[%s2745_s11 + $0x178] sm:$0xf0] }
 0x164   :  { %1150 = vmatpush.bf16.msra.mxu2 %v1651_v13  ;;  %v1865_v13 = vld [vmem:[%s2745_s11 + $0x10c] sm:$0xf]  ;;  %v1751_v22 = vor.u32 %v1879_v21, %v1750_v20 }
 0x168   :  { %1151 = vmatpush.bf16.msra.mxu2 %v1639_v26 }
 0x1e6   :  { %v662_v30 = vpop.f32.mrf.mxu2 }
 0x1e7   :  { %v663_v32 = vadd.f32 %v1884_v31, %v662_v30  ;;  %v1611_v30 = vor.u32 %v1845_v18, %v1610_v17  ;;  %v1855_v17 = vld [vmem:[%s2745_s11 + $0xb8] sm:$0xf0]  ;;  %v1699_v18 = vor.u32 %v1865_v13, %v1696_v15  ;;  %v1570_v13 = vld [vmem:[%s2745_s11 + $0x8] sm:$0xf] }
 0x1e8   :  { %v1666_v15 = vld [vmem:[%s2745_s11 + $0xc8] sm:$0xf] }
 0x1e9   :  { %v667_v35 = vmax.f32 %v663_v32, 0.0  ;;  %v1871_v32 = vld [vmem:[%s2745_s11 + $0x13c] sm:$0xf]  ;;  %1125 = vmatpush.bf16.msra.mxu0 %v1611_v30 }
 0x1ee   :  { %v664_v33 = vpop.f32.mrf.mxu2 }
 0x1ef   :  { %v665_v34 = vadd.f32 %v1884_v31, %v664_v33  ;;  %v1624_v31 = vld [vmem:[%s2745_s11 + $0x84] sm:$0xf0] }
 0x1f0   :  { %v1720_v33 = vld [vmem:[%s2745_s11 + $0x144] sm:$0xf0]  ;;  %v1627_v38 = vor.u32 %v1847_v29, %v1624_v31  ;;  %v1852_v29 = vld [vmem:[%s2745_s11 + $0xa0] sm:$0xf0] }
 0x1f1   :  { %v668_v36 = vmax.f32 %v665_v34, 0.0  ;;  %v1707_v34 = vor.u32 %v1869_v25, %v1706_v24  ;;  %v1723_v40 = vor.u32 %v1871_v32, %v1720_v33  ;;  %v1588_v24 = vld [vmem:[%s2745_s11 + $0x3c] sm:$0xf0]  ;;  %v1862_v25 = vld [vmem:[%s2745_s11 + $0xf4] sm:$0xf] }
 0x1f2   :  { %1152 = vmatpush.bf16.msra.mxu2 %v1627_v38  ;;  %v1591_v26 = vor.u32 %v1838_v23, %v1588_v24  ;;  %v1687_v30 = vor.u32 %v1862_v25, %v1684_v27  ;;  %v1738_v32 = vld [vmem:[%s2745_s11 + $0x158] sm:$0xf]  ;;  %v1876_v33 = vld [vmem:[%s2745_s11 + $0x160] sm:$0xf0] }
 0x1f3   :  { %v669_v37 = vpack.c.bf16 %v668_v36, %v667_v35  ;;  %v1598_v35 = vld [vmem:[%s2745_s11 + $0x48] sm:$0xf]  ;;  %v1842_v36 = vld [vmem:[%s2745_s11 + $0x50] sm:$0xf0]  ;;  %1139 = vmatpush.bf16.msra.mxu1 %v1707_v34  ;;  %v1739_v34 = vor.u32 %v1876_v33, %v1738_v32 }
 0x1f4   :  { %v1599_v45 = vor.u32 %v1842_v36, %v1598_v35  ;;  %v1835_v35 = vld [vmem:[%s2745_s11 + $0x1c] sm:$0xf]  ;;  %v1576_v36 = vld [vmem:[%s2745_s11 + $0x24] sm:$0xf0] }
 0x1f5   :  { %1525 = vmatmul.msk.bf16.vlgmr.msra.gmra.mxu3 %vm682_vm1, %v669_v37  ;;  %v1694_v37 = vld [vmem:[%s2745_s11 + $0x108] sm:$0xf]  ;;  %v1579_v38 = vor.u32 %v1835_v35, %v1576_v36  ;;  %v858_v36 = vld [vmem:[%s2746_s12] sm:$0x7]  ;;  %s1924_s12 = smov [#allocation2]  }
 0x1f6   :  { %1164 = vmatpush.bf16.msra.mxu3 %v1747_v19  ;;  %v1695_v46 = vor.u32 %v1866_v39, %v1694_v37  ;;  %1126 = vmatpush.bf16.msra.mxu0 %v1599_v45  ;;  %v1655_v19 = vor.u32 %v1855_v17, %v1654_v16  ;;  %v1859_v37 = vld [vmem:[%s2745_s11 + $0xdc] sm:$0xf]  ;;  %v1672_v39 = vld [vmem:[%s2745_s11 + $0xe4] sm:$0xf0]  ;;  %v1873_v45 = vld [vmem:[%s2745_s11 + $0x148] sm:$0xf0] }
 0x1f7   :  { %1153 = vmatpush.bf16.msra.mxu2 %v1615_v49  ;;  %v1675_v42 = vor.u32 %v1859_v37, %v1672_v39  ;;  %v1856_v49 = vld [vmem:[%s2745_s11 + $0xc4] sm:$0xf]  ;;  %v1858_v16 = vld [vmem:[%s2745_s11 + $0xd0] sm:$0xf0]  ;;  %v860_v37 = vperm.slane %v858_v36, 0  ;;  %s1222_s20 = sshll.u32 %s1924_s12, 4  ;;  %s1223_s20 = int_to_ptr.vmem [resolvable:$true] %s1222_s20 }
 0x1f8   :  { %1140 = vmatpush.bf16.msra.mxu1 %v1695_v46  ;;  %v1727_v46 = vor.u32 %v1873_v45, %v1726_v44 }
 0x1fa   :  { %1165 = vmatpush.bf16.msra.mxu3 %v1735_v28  ;;  %1127 = vmatpush.bf16.msra.mxu0 %v1587_v54  ;;  %v1642_v28 = vld [vmem:[%s2745_s11 + $0x98] sm:$0xf]  ;;  %v1663_v54 = vor.u32 %v1856_v49, %v1660_v51 }
 0x1fb   :  { %1154 = vmatpush.bf16.msra.mxu2 %v1603_v14  ;;  %v1643_v31 = vor.u32 %v1852_v29, %v1642_v28  ;;  %v1834_v14 = vld [vmem:[%s2745_s11 + $0x10] sm:$0xf0] }
 0x1fc   :  { %1141 = vmatpush.bf16.msra.mxu1 %v1683_v56  ;;  %v1714_v56 = vld [vmem:[%s2745_s11 + $0x128] sm:$0xf]  ;;  %v1571_v17 = vor.u32 %v1834_v14, %v1570_v13 }
 0x1fd   :  { %v1715_v58 = vor.u32 %v1870_v57, %v1714_v56 }
 0x1fe   :  { %1166 = vmatpush.bf16.msra.mxu3 %v1723_v40  ;;  %1128 = vmatpush.bf16.msra.mxu0 %v1575_v61  ;;  %v1630_v40 = vld [vmem:[%s2745_s11 + $0x80] sm:$0xf]  ;;  %v1702_v61 = vld [vmem:[%s2745_s11 + $0x110] sm:$0xf] }
 0x1ff   :  { %1155 = vmatpush.bf16.msra.mxu2 %v1591_v26  ;;  %v1631_v43 = vor.u32 %v1849_v41, %v1630_v40 }
 0x200   :  { %1142 = vmatpush.bf16.msra.mxu1 %v1671_v63  ;;  %v1867_v63 = vld [vmem:[%s2745_s11 + $0x118] sm:$0xf0] }
 0x201   :  { %v1703_v0 = vor.u32 %v1867_v63, %v1702_v61 }
 0x202   :  { %1167 = vmatpush.bf16.msra.mxu3 %v1711_v53  ;;  %1129 = vmatpush.bf16.msra.mxu0 %v1563_v6  ;;  %v1846_v53 = vld [vmem:[%s2745_s11 + $0x70] sm:$0xf0] }
 0x203   :  { %1156 = vmatpush.bf16.msra.mxu2 %v1579_v38 }
 0x204   :  { %1143 = vmatpush.bf16.msra.mxu1 %v1659_v9  ;;  %v1678_v9 = vld [vmem:[%s2745_s11 + $0xe0] sm:$0xf] }
 0x206   :  { %1168 = vmatpush.bf16.msra.mxu3 %v1699_v18  ;;  %1178 = vmatpush.bf16.msrb.mxu0 %v1655_v19  ;;  %v1667_v18 = vor.u32 %v1858_v16, %v1666_v15  ;;  %v711_v19 = vld [vmem:[%s2744_s10] sm:$0x3] }
 0x207   :  { %v714_v23 = vperm.slane %v711_v19, 1 }
 0x208   :  { %1192 = vmatpush.bf16.msrb.mxu1 %v1751_v22  ;;  %v713_v22 = vperm.slane %v711_v19, 0 }
 0x20a   :  { %1169 = vmatpush.bf16.msra.mxu3 %v1687_v30  ;;  %1179 = vmatpush.bf16.msrb.mxu0 %v1643_v31 }
 0x20c   :  { %1193 = vmatpush.bf16.msrb.mxu1 %v1739_v34 }
 0x20e   :  { %1170 = vmatpush.bf16.msra.mxu3 %v1675_v42  ;;  %1180 = vmatpush.bf16.msrb.mxu0 %v1631_v43  ;;  %v861_v42 = vperm.slane %v858_v36, 1 }
 0x210   :  { %1194 = vmatpush.bf16.msrb.mxu1 %v1727_v46 }
 0x212   :  { %1171 = vmatpush.bf16.msra.mxu3 %v1663_v54 }
 0x214   :  { %1195 = vmatpush.bf16.msrb.mxu1 %v1715_v58 }
 0x218   :  { %1196 = vmatpush.bf16.msrb.mxu1 %v1703_v0 }
 0x278   :  { %v695_v50 = vpop.f32.mrf.mxu3 }
 0x279   :  { %v696_v62 = vadd.f32 %v1885_v55, %v695_v50  ;;  %v1567_v50 = vor.u32 %v1832_v47, %v1564_v48 }
 0x27b   :  { %v700_v7 = vmax.f32 %v696_v62, 0.0  ;;  %1157 = vmatpush.bf16.msra.mxu2 %v1567_v50  ;;  %v1607_v62 = vor.u32 %v1843_v60, %v1606_v59 }
 0x280   :  { %v697_v2 = vpop.f32.mrf.mxu3 }
 0x281   :  { %v698_v3 = vadd.f32 %v1885_v55, %v697_v2  ;;  %v1619_v55 = vor.u32 %v1846_v53, %v1618_v52  ;;  %v1840_v2 = vld [vmem:[%s2745_s11 + $0x40] sm:$0xf0]  ;;  %v862_v52 = vperm.slane %v858_v36, 2 }
 0x282   :  { %v1595_v4 = vor.u32 %v1840_v2, %v1594_v1 }
 0x283   :  { %v701_v8 = vmax.f32 %v698_v3, 0.0  ;;  %1181 = vmatpush.bf16.msrb.mxu0 %v1619_v55  ;;  %v1690_v3 = vld [vmem:[%s2745_s11 + $0xf8] sm:$0xf] }
 0x284   :  { %v1691_v6 = vor.u32 %v1864_v5, %v1690_v3 }
 0x285   :  { %v702_v10 = vpack.c.bf16 %v701_v8, %v700_v7  ;;  %v1582_v7 = vld [vmem:[%s2745_s11 + $0x20] sm:$0xf]  ;;  %v1837_v8 = vld [vmem:[%s2745_s11 + $0x28] sm:$0xf0] }
 0x286   :  { %v1583_v11 = vor.u32 %v1837_v8, %v1582_v7  ;;  %1197 = vmatpush.bf16.msrb.mxu1 %v1691_v6 }
 0x287   :  { %1558 = vmatmul.msk.bf16.vlgmr.msrb.gmra.mxu2 %vm649_vm0, %v702_v10  ;;  %1559 = vmatmul.msk.bf16.vlgmr.msrb.gmra.mxu3 %vm649_vm0, %v702_v10  ;;  %v1861_v10 = vld [vmem:[%s2745_s11 + $0xe8] sm:$0xf0] }
 0x288   :  { %1182 = vmatpush.bf16.msrb.mxu0 %v1607_v62  ;;  %v1679_v12 = vor.u32 %v1861_v10, %v1678_v9 }
 0x28a   :  { %1198 = vmatpush.bf16.msrb.mxu1 %v1679_v12 }
 0x28c   :  { %1183 = vmatpush.bf16.msrb.mxu0 %v1595_v4 }
 0x28e   :  { %1199 = vmatpush.bf16.msrb.mxu1 %v1667_v18 }
 0x290   :  { %1184 = vmatpush.bf16.msrb.mxu0 %v1583_v11 }
 0x294   :  { %1185 = vmatpush.bf16.msrb.mxu0 %v1571_v17 }
 0x30a   :  { %v769_v20 = vpop.f32.mrf.mxu2  ;;  %v783_v21 = vpop.f32.mrf.mxu3 }
 0x30b   :  { %v770_v24 = vadd.f32 %v769_v20, %v713_v22  ;;  %v784_v25 = vadd.f32 %v783_v21, %v714_v23 }
 0x30d   :  { %v788_v30 = vmax.f32 %v770_v24, 0.0  ;;  %v789_v31 = vmax.f32 %v784_v25, 0.0 }
 0x312   :  { %v771_v26 = vpop.f32.mrf.mxu2  ;;  %v785_v27 = vpop.f32.mrf.mxu3 }
 0x313   :  { %v772_v28 = vadd.f32 %v771_v26, %v713_v22  ;;  %v786_v29 = vadd.f32 %v785_v27, %v714_v23 }
 0x315   :  { %v790_v32 = vmax.f32 %v772_v28, 0.0  ;;  %v791_v33 = vmax.f32 %v786_v29, 0.0 }
 0x317   :  { %v792_v34 = vpack.c.bf16 %v790_v32, %v788_v30  ;;  %v793_v35 = vpack.c.bf16 %v791_v33, %v789_v31 }
 0x319   :  { %1130 = vmatmul.bf16.vlgmr.msra.gmra.mxu0 %v792_v34  ;;  %1144 = vmatmul.bf16.vlgmr.msra.gmra.mxu1 %v793_v35 }
 0x31a   :  { %1158 = vmatmul.bf16.vlgmr.msra.gmra.mxu2 %v792_v34  ;;  %1172 = vmatmul.bf16.vlgmr.msra.gmra.mxu3 %v793_v35 }
 0x329   :  { %1186 = vmatmul.bf16.vlgmr.msrb.gmra.mxu0 %v792_v34  ;;  %1200 = vmatmul.bf16.vlgmr.msrb.gmra.mxu1 %v793_v35 }
 0x396   :  { %v1131_v38 = vpop.f32.mrf.mxu0  ;;  %v1145_v39 = vpop.f32.mrf.mxu1 }
 0x397   :  { %v1132_v40 = vadd.f32 %v1131_v38, %v860_v37 }
 0x399   :  { %v1146_v41 = vadd.f32 %v1145_v39, %v1132_v40 }
 0x39b   :  { %1886 = vtanh.f32 %v1146_v41 }
 0x39d   :  { %v1159_v43 = vpop.f32.mrf.mxu2  ;;  %v1173_v44 = vpop.f32.mrf.mxu3 }
 0x39e   :  { %v1160_v45 = vadd.f32 %v1159_v43, %v861_v42  ;;  %v1133_v46 = vpop.f32.mrf.mxu0  ;;  %v1147_v47 = vpop.f32.mrf.mxu1 }
 0x39f   :  { %v1134_v48 = vadd.f32 %v1133_v46, %v860_v37 }
 0x3a0   :  { %v1174_v49 = vadd.f32 %v1173_v44, %v1160_v45 }
 0x3a1   :  { %v1887_v50 = vpop.eup %1886  ;;  %v1148_v51 = vadd.f32 %v1147_v47, %v1134_v48 }
 0x3a2   :  { %1212 = vst [vmem:[#allocation2] sm:$0xff] %v1887_v50  ;;  %1888 = vtanh.f32 %v1174_v49 }
 0x3a3   :  { %1890 = vtanh.f32 %v1148_v51 }
 0x3a5   :  { %v1161_v53 = vpop.f32.mrf.mxu2  ;;  %v1175_v57 = vpop.f32.mrf.mxu3 }
 0x3a6   :  { %v1162_v54 = vadd.f32 %v1161_v53, %v861_v42  ;;  %v1187_v55 = vpop.f32.mrf.mxu0  ;;  %v1201_v56 = vpop.f32.mrf.mxu1 }
 0x3a7   :  { %v1188_v58 = vadd.f32 %v1187_v55, %v862_v52 }
 0x3a8   :  { %v1889_v59 = vpop.eup %1888  ;;  %v1176_v60 = vadd.f32 %v1175_v57, %v1162_v54 }
 0x3a9   :  { %v1891_v61 = vpop.eup %1890  ;;  %1213 = vst [vmem:[#allocation2 + $0x8] sm:$0xff] %v1889_v59  ;;  %v1202_v62 = vadd.f32 %v1201_v56, %v1188_v58 }
 0x3aa   :  { %1215 = vst [vmem:[#allocation2 + $0x18] sm:$0xff] %v1891_v61  ;;  %1892 = vtanh.f32 %v1176_v60 }
 0x3ab   :  { %1894 = vtanh.f32 %v1202_v62 }
 0x3ae   :  { %v1189_v63 = vpop.f32.mrf.mxu0  ;;  %v1203_v2 = vpop.f32.mrf.mxu1 }
 0x3af   :  { %v1190_v0 = vadd.f32 %v1189_v63, %v862_v52 }
 0x3b0   :  { %v1893_v1 = vpop.eup %1892 }
 0x3b1   :  { %v1895_v3 = vpop.eup %1894  ;;  %1216 = vst [vmem:[#allocation2 + $0x20] sm:$0xff] %v1893_v1  ;;  %v1204_v4 = vadd.f32 %v1203_v2, %v1190_v0 }
 0x3b2   :  { %1214 = vst [vmem:[#allocation2 + $0x10] sm:$0xff] %v1895_v3 }
 0x3b3   :  { %1896 = vtanh.f32 %v1204_v4 }
 0x3b9   :  { %v1897_v5 = vpop.eup %1896 }
 0x3ba   :  { %1217 = vst [vmem:[#allocation2 + $0x28] sm:$0xff] %v1897_v5 }
 0x3bb   :  { %1230 = dma.vmem_to_hbm [thread:$0]  %s1223_s20, 768, %s1225_s22, [#allocation3], %s1925_s23, %s1925_s23, %s1926_s24  }
 0x3bc   :  { %1922 = dma.done.wait [#allocation3], 768  }
 0x3bd   :  { %1923 = vsyncadd [#allocation3], 4294966528 }
 0x3be   :  { %1235 = vsyncpa [#allocation3], 1 }

</bundles_post_ra>
